<compile_context>
chip_gen: v6e
topology: v6e:2x2x1
jax: 0.10.0
libtpu: 0.0.40
codegen_flags: <defaults>
</compile_context>

<pallas_src>
import jax
import jax.numpy as jnp
from jax import lax
from jax.experimental import pallas as pl
from jax.experimental.pallas import tpu as pltpu


def _patch_embed_kernel(x_ref, w_ref, b_ref, cls_ref, pos_ref, o_ref):
    Nb, NP, K = x_ref.shape
    tE = o_ref.shape[-1]

    w = w_ref[...]
    if NP % 8 == 0 or Nb == 1:
        # Fold the batch block into the matmul M dimension: (Nb*NP, K) @ (K, tE).
        # Collapsing the leading dim is layout-trivial when NP is a sublane multiple.
        patches = x_ref[...].reshape(Nb * NP, K)
        proj = jnp.dot(patches, w, preferred_element_type=jnp.float32)
        proj = proj.reshape(Nb, NP, tE)
    else:
        # Non-sublane-aligned NP: avoid a reshuffling copy, do per-image matmuls.
        proj = lax.dot_general(
            x_ref[...], w, (((2,), (0,)), ((), ())),
            preferred_element_type=jnp.float32)

    proj = proj + b_ref[...].astype(jnp.float32)              # (Nb, NP, tE)

    # Prepend the CLS token row for every batch element, add positional embedding,
    # and store the whole (Nb, NP+1, tE) slab at once (single dense store).
    cls = jnp.broadcast_to(cls_ref[...], (Nb, 1, tE)).astype(jnp.float32)
    tokens = jnp.concatenate([cls, proj], axis=1)              # (Nb, NP+1, tE)
    o_ref[...] = (tokens + pos_ref[...].astype(jnp.float32)).astype(o_ref.dtype)


def _pick_batch_block(batch, num_patches, target_rows=256):
    """Largest divisor of `batch` with Nb*num_patches near target MXU M rows."""
    nb = max(1, min(batch, target_rows // max(1, num_patches)))
    while batch % nb != 0:
        nb -= 1
    return nb


def _pick_embed_tile(embed_dim, max_tile=512):
    """Embedding tile: full E when small/unaligned, else largest 128-multiple divisor."""
    if embed_dim <= max_tile or embed_dim % 128 != 0:
        return embed_dim
    t = max_tile - (max_tile % 128)
    while t >= 128:
        if embed_dim % t == 0:
            return t
        t -= 128
    return 128


def patch_embedding(x, w_proj, b_proj, cls_token, pos_embed, *, patch_size):
    """x: (B, C, H, W).  w_proj: (E, C, P, P) (PyTorch Conv2d weight).  b_proj: (E,).
    cls_token: (1, 1, E).  pos_embed: (1, num_patches+1, E).
    Returns (B, num_patches+1, E) — same math as PatchEmbedding.forward."""
    B, C, H, W = x.shape
    P = patch_size
    E = w_proj.shape[0]
    Gh, Gw = H // P, W // P
    NP = Gh * Gw
    K = C * P * P

    # im2col: pure layout (this is what the stride==kernel Conv2d does internally).
    patches = (x.reshape(B, C, Gh, P, Gw, P)
                 .transpose(0, 2, 4, 1, 3, 5)
                 .reshape(B, NP, K))

    w_mat = w_proj.reshape(E, K).T                            # (K, E): patches @ w_mat
    b_row = b_proj.reshape(1, E)

    Nb = _pick_batch_block(B, NP)
    tE = _pick_embed_tile(E)
    grid = (B // Nb, E // tE)

    out_dtype = jnp.promote_types(x.dtype, w_proj.dtype)

    out = pl.pallas_call(
        _patch_embed_kernel,
        out_shape=jax.ShapeDtypeStruct((B, NP + 1, E), out_dtype),
        grid_spec=pltpu.PrefetchScalarGridSpec(
            num_scalar_prefetch=0,
            grid=grid,
            in_specs=[
                pl.BlockSpec((Nb, NP, K), lambda n, e: (n, 0, 0)),      # patches
                pl.BlockSpec((K, tE), lambda n, e: (0, e)),             # weight
                pl.BlockSpec((1, tE), lambda n, e: (0, e)),             # bias
                pl.BlockSpec((1, 1, tE), lambda n, e: (0, 0, e)),       # cls token
                pl.BlockSpec((1, NP + 1, tE), lambda n, e: (0, 0, e)),  # pos embed
            ],
            out_specs=pl.BlockSpec((Nb, NP + 1, tE), lambda n, e: (n, 0, e)),
        ),
        compiler_params=pltpu.CompilerParams(
            dimension_semantics=("parallel", "parallel"),
            vmem_limit_bytes=48 * 1024 * 1024,
        ),
    )(patches, w_mat, b_row, cls_token, pos_embed)

    return out


# ---------------------------------------------------------------------------
# pure-JAX reference (real strided convolution, no Pallas) for correctness
# ---------------------------------------------------------------------------
def reference(x, w_proj, b_proj, cls_token, pos_embed, *, patch_size):
    P = patch_size
    B = x.shape[0]
    E = w_proj.shape[0]
    y = lax.conv_general_dilated(
        x, w_proj, window_strides=(P, P), padding="VALID",
        dimension_numbers=("NCHW", "OIHW", "NCHW"))           # (B, E, Gh, Gw)
    y = y + b_proj.reshape(1, E, 1, 1)
    y = y.reshape(B, E, -1).transpose(0, 2, 1)                # (B, NP, E)
    cls = jnp.broadcast_to(cls_token, (B, 1, E))
    return jnp.concatenate([cls, y], axis=1) + pos_embed


if __name__ == "__main__":
    # small ViT-style shapes: 16x16 image, 4x4 patches, 3 channels, embed_dim=128
    img_size, patch_size, in_channels, embed_dim, batch = 16, 4, 3, 128, 2
    num_patches = (img_size // patch_size) ** 2               # 16

    key = jax.random.PRNGKey(0)
    k_x, k_w, k_b, k_cls, k_pos = jax.random.split(key, 5)

    x = jax.random.normal(k_x, (batch, in_channels, img_size, img_size), jnp.float32)
    w_proj = jax.random.normal(
        k_w, (embed_dim, in_channels, patch_size, patch_size), jnp.float32) * 0.1
    b_proj = jax.random.normal(k_b, (embed_dim,), jnp.float32) * 0.1
    # (zeros at PyTorch init; random here so the cls/pos additions are actually checked)
    cls_token = jax.random.normal(k_cls, (1, 1, embed_dim), jnp.float32) * 0.02
    pos_embed = jax.random.normal(k_pos, (1, num_patches + 1, embed_dim), jnp.float32) * 0.02

    out = patch_embedding(x, w_proj, b_proj, cls_token, pos_embed, patch_size=patch_size)
    out = jax.block_until_ready(out)

    ref = reference(x, w_proj, b_proj, cls_token, pos_embed, patch_size=patch_size)
    assert out.shape == (batch, num_patches + 1, embed_dim)
    assert jnp.allclose(out, ref, atol=1e-3, rtol=1e-3), "mismatch vs reference"

    print("KERNEL_OK")
</pallas_src>

<mosaic_0001>
module attributes {stable_mosaic.version = 11 : i64} {
  func.func @_patch_embed_kernel(%arg0: i32, %arg1: i32, %arg2: memref<2x16x48xf32, #tpu.memory_space<vmem>>, %arg3: memref<48x128xf32, #tpu.memory_space<vmem>>, %arg4: memref<1x128xf32, #tpu.memory_space<vmem>>, %arg5: memref<1x1x128xf32, #tpu.memory_space<vmem>>, %arg6: memref<1x17x128xf32, #tpu.memory_space<vmem>>, %arg7: memref<2x17x128xf32, #tpu.memory_space<vmem>>) attributes {dimension_semantics = [#tpu.dimension_semantics<parallel>, #tpu.dimension_semantics<parallel>], iteration_bounds = array<i64: 1, 1>, scalar_prefetch = 0 : i64, scratch_operands = 0 : i64, tpu.core_type = #tpu.core_type<tc>, window_params = [{transform_indices = @transform_0, window_bounds = array<i64: 2, 16, 48>}, {transform_indices = @transform_1, window_bounds = array<i64: 48, 128>}, {transform_indices = @transform_2, window_bounds = array<i64: 1, 128>}, {transform_indices = @transform_3, window_bounds = array<i64: 1, 1, 128>}, {transform_indices = @transform_4, window_bounds = array<i64: 1, 17, 128>}, {transform_indices = @transform_5, window_bounds = array<i64: 2, 17, 128>}]} {
    %c0 = arith.constant 0 : index
    %c0_0 = arith.constant 0 : index
    %0 = vector.load %arg3[%c0, %c0_0] : memref<48x128xf32, #tpu.memory_space<vmem>>, vector<48x128xf32>
    %c0_1 = arith.constant 0 : index
    %c0_2 = arith.constant 0 : index
    %c0_3 = arith.constant 0 : index
    %1 = vector.load %arg2[%c0_1, %c0_2, %c0_3] : memref<2x16x48xf32, #tpu.memory_space<vmem>>, vector<2x16x48xf32>
    %2 = vector.shape_cast %1 : vector<2x16x48xf32> to vector<32x48xf32>
    %cst = arith.constant dense<0.000000e+00> : vector<32x128xf32>
    %3 = tpu.matmul %2, %0, %cst {dimension_numbers = #tpu.dot_dimension_numbers<[1], [0], [0], [1], [0, 0, 1, 1], [], []>} : vector<32x48xf32>, vector<48x128xf32>, vector<32x128xf32> -> vector<32x128xf32>
    %4 = vector.shape_cast %3 : vector<32x128xf32> to vector<2x16x128xf32>
    %c0_4 = arith.constant 0 : index
    %c0_5 = arith.constant 0 : index
    %5 = vector.load %arg4[%c0_4, %c0_5] : memref<1x128xf32, #tpu.memory_space<vmem>>, vector<1x128xf32>
    %6 = vector.shape_cast %5 : vector<1x128xf32> to vector<1x1x128xf32>
    %7 = vector.broadcast %6 : vector<1x1x128xf32> to vector<2x16x128xf32>
    %8 = arith.addf %4, %7 : vector<2x16x128xf32>
    %c0_6 = arith.constant 0 : index
    %c0_7 = arith.constant 0 : index
    %c0_8 = arith.constant 0 : index
    %9 = vector.load %arg5[%c0_6, %c0_7, %c0_8] : memref<1x1x128xf32, #tpu.memory_space<vmem>>, vector<1x1x128xf32>
    %10 = vector.shape_cast %9 : vector<1x1x128xf32> to vector<1x1x128xf32>
    %11 = vector.broadcast %10 : vector<1x1x128xf32> to vector<2x1x128xf32>
    %12 = tpu.concatenate %11, %8 in 1 : vector<2x1x128xf32>, vector<2x16x128xf32> -> vector<2x17x128xf32>
    %c0_9 = arith.constant 0 : index
    %c0_10 = arith.constant 0 : index
    %c0_11 = arith.constant 0 : index
    %13 = vector.load %arg6[%c0_9, %c0_10, %c0_11] : memref<1x17x128xf32, #tpu.memory_space<vmem>>, vector<1x17x128xf32>
    %14 = vector.broadcast %13 : vector<1x17x128xf32> to vector<2x17x128xf32>
    %15 = arith.addf %12, %14 : vector<2x17x128xf32>
    %c0_12 = arith.constant 0 : index
    %c0_13 = arith.constant 0 : index
    %c0_14 = arith.constant 0 : index
    %16 = vector.load %arg7[%c0_12, %c0_13, %c0_14] : memref<2x17x128xf32, #tpu.memory_space<vmem>>, vector<2x17x128xf32>
    tpu.vector_store %arg7[%c0_12, %c0_13, %c0_14], %15 {strides = array<i32>} : memref<2x17x128xf32, #tpu.memory_space<vmem>>, vector<2x17x128xf32>,
    return
  }
  func.func @transform_0(%arg0: i32, %arg1: i32) -> (i32, i32, i32) {
    %c0_i32 = arith.constant 0 : i32
    %c0_i32_0 = arith.constant 0 : i32
    %c0_i32_1 = arith.constant 0 : i32
    return %arg0, %c0_i32, %c0_i32_0 : i32, i32, i32
  }
  func.func @transform_1(%arg0: i32, %arg1: i32) -> (i32, i32) {
    %c0_i32 = arith.constant 0 : i32
    %c0_i32_0 = arith.constant 0 : i32
    return %c0_i32, %arg1 : i32, i32
  }
  func.func @transform_2(%arg0: i32, %arg1: i32) -> (i32, i32) {
    %c0_i32 = arith.constant 0 : i32
    %c0_i32_0 = arith.constant 0 : i32
    return %c0_i32, %arg1 : i32, i32
  }
  func.func @transform_3(%arg0: i32, %arg1: i32) -> (i32, i32, i32) {
    %c0_i32 = arith.constant 0 : i32
    %c0_i32_0 = arith.constant 0 : i32
    %c0_i32_1 = arith.constant 0 : i32
    return %c0_i32, %c0_i32_0, %arg1 : i32, i32, i32
  }
  func.func @transform_4(%arg0: i32, %arg1: i32) -> (i32, i32, i32) {
    %c0_i32 = arith.constant 0 : i32
    %c0_i32_0 = arith.constant 0 : i32
    %c0_i32_1 = arith.constant 0 : i32
    return %c0_i32, %c0_i32_0, %arg1 : i32, i32, i32
  }
  func.func @transform_5(%arg0: i32, %arg1: i32) -> (i32, i32, i32) {
    %c0_i32 = arith.constant 0 : i32
    %c0_i32_0 = arith.constant 0 : i32
    return %arg0, %c0_i32, %arg1 : i32, i32, i32
  }
}

</mosaic_0001>

<bundles_post_ra>
// kernel: tpu_custom_call.1
= control target key start
LH: loop header
LB: loop body
LE: loop exit
PB: predicated region body
PF: predicated region fallthrough
CT: control target
= control target key end

     0   :  { %10 = vsyncpa [#allocation3], 0  ;;  %s263_s18 = smov [#allocation2]   ;;  %s344_s0 = inlined_call_operand.vmem [shape: f32[2,16,48], index: 0, kind: input, shape index: {}]   ;;  %s345_s1 = inlined_call_operand.hbm [shape: f32[48,128], index: 1, kind: input, shape index: {}]   ;;  %s346_s2 = inlined_call_operand.vmem [shape: f32[1,128], index: 2, kind: input, shape index: {}]   ;;  %s347_s3 = inlined_call_operand.vmem [shape: f32[1,1,128], index: 3, kind: input, shape index: {}]   ;;  %s348_s4 = inlined_call_operand.vmem [shape: f32[1,17,128], index: 4, kind: input, shape index: {}]   ;;  %s349_s5 = inlined_call_operand.vmem [shape: f32[2,17,128], index: 5, kind: output, shape index: {}]  }
   0x1   :  { %s18_s19 = sshll.u32 %s263_s18, 4  ;;  %s19_s19 = int_to_ptr.vmem [resolvable:$true] %s18_s19 }
   0x2   :  { %s249_s20 = scalar_lea.vmem %s19_s19, 768  ;;  %p254_p1 = scmp.lt.s32.totalorder %s19_s19, %s19_s19 }
   0x3   :  { %p250_p0 = scmp.ne.s32.totalorder %s19_s19, %s249_s20  ;;  %p255_p2 = scmp.lt.s32.totalorder %s249_s20, %s249_s20 }
   0x5   :  { %p256_p3 = por %p255_p2, %p254_p1 }
   0x7   :  { %p257_p4 = pnand %p256_p3, %p250_p0 }
   0x9   :  { %260 = shalt.err (!%p257_p4)
}
   0xa   :  { %s264_s21 = smov 128   ;;  %s265_s22 = smov 8  }
   0xb   :  { %24 = dma.hbm_to_vmem [thread:$0]  %s345_s1, 768, %s19_s19, [#allocation3], %s264_s21, %s264_s21, %s265_s22  }
   0xc   :  { %261 = dma.done.wait [#allocation3], 768  }
   0xd   :  { %262 = vsyncadd [#allocation3], 4294966528  ;;  %v39_v0 = vld [vmem:[#allocation2 + $0x28] sm:$0xff]  ;;  %v38_v1 = vld [vmem:[#allocation2 + $0x20] sm:$0xff]  ;;  %vm44_vm0 = vcmask 392192   ;;  %vm158_vm1 = vcmask 1040384  }
   0xe   :  { %208 = vmatprep.subr.mxu0 %v39_v0  ;;  %226 = vmatprep.subr.mxu1 %v39_v0  ;;  %v37_v2 = vld [vmem:[#allocation2 + $0x18] sm:$0xff]  ;;  %v36_v3 = vld [vmem:[#allocation2 + $0x10] sm:$0xff]  ;;  %v35_v4 = vld [vmem:[#allocation2 + $0x8] sm:$0xff] }
   0xf   :  { %209 = vmatpush3.msra.mxu0 %v39_v0  ;;  %232 = vmatpush3.msra.mxu1 %v39_v0  ;;  %v34_v5 = vld [vmem:[#allocation2] sm:$0xff]  ;;  %v42_v7 = vld [vmem:[%s344_s0 + $0x10] sm:$0xff]  ;;  %v41_v8 = vld [vmem:[%s344_s0 + $0x8] sm:$0xff] }
  0x10   :  { %210 = vmatprep.subr.mxu0 %v38_v1  ;;  %227 = vmatprep.subr.mxu1 %v38_v1  ;;  %v40_v6 = vld [vmem:[%s344_s0] sm:$0xff]  ;;  %v43_v9 = vld [vmem:[%s344_s0 + $0x18] sm:$0xff]  ;;  %v175_v15 = vld [vmem:[%s348_s4 + $0x10] sm:$0x1] }
  0x11   :  { %211 = vmatpush3.msra.mxu0 %v38_v1  ;;  %233 = vmatpush3.msra.mxu1 %v38_v1  ;;  %v197_v10 = vld [vmem:[%s346_s2] ss:$0 sm:$0xff]  ;;  %v174_v27 = vld [vmem:[%s348_s4 + $0x8] sm:$0xff] }
  0x12   :  { %212 = vmatprep.subr.mxu0 %v37_v2  ;;  %228 = vmatprep.subr.mxu1 %v37_v2  ;;  %v153_v22 = vld [vmem:[%s347_s3] sm:$0x1] }
  0x13   :  { %213 = vmatpush3.msra.mxu0 %v37_v2  ;;  %234 = vmatpush3.msra.mxu1 %v37_v2  ;;  %v173_v26 = vld [vmem:[%s348_s4] sm:$0xff] }
  0x14   :  { %214 = vmatprep.subr.mxu0 %v36_v3  ;;  %229 = vmatprep.subr.mxu1 %v36_v3 }
  0x15   :  { %215 = vmatpush3.msra.mxu0 %v36_v3  ;;  %235 = vmatpush3.msra.mxu1 %v36_v3 }
  0x16   :  { %216 = vmatprep.subr.mxu0 %v35_v4  ;;  %230 = vmatprep.subr.mxu1 %v35_v4 }
  0x17   :  { %217 = vmatpush3.msra.mxu0 %v35_v4  ;;  %236 = vmatpush3.msra.mxu1 %v35_v4 }
  0x18   :  { %218 = vmatprep.subr.mxu0 %v34_v5  ;;  %231 = vmatprep.subr.mxu1 %v34_v5 }
  0x19   :  { %219 = vmatpush3.msra.mxu0 %v34_v5  ;;  %237 = vmatpush3.msra.mxu1 %v34_v5 }
  0x1a   :  { %220 = vmatprep.mubr.msk.f32.mxu0 %vm44_vm0, %v40_v6  ;;  %223 = vmatprep.mubr.msk.f32.mxu1 %vm44_vm0, %v42_v7 }
  0x1b   :  { %221 = vmatmul.mubr.msk.f32.vlgmr.msra.gmra.mxu0 %vm44_vm0, %v41_v8  ;;  %224 = vmatmul.mubr.msk.f32.vlgmr.msra.gmra.mxu1 %vm44_vm0, %v43_v9 }
  0xdb   :  { %v222_v11 = vpop.f32.mrf.mxu0  ;;  %v225_v12 = vpop.f32.mrf.mxu1 }
  0xdc   :  { %v150_v13 = vadd.f32 %v222_v11, %v197_v10  ;;  %v152_v14 = vadd.f32 %v225_v12, %v197_v10 }
  0xdd   :  { %v123_v16 = vpop.f32.mrf.mxu0  ;;  %v133_v17 = vpop.f32.mrf.mxu1 }
  0xde   :  { %v160_v18 = vrot.slane %v150_v13, 7  ;;  %v163_v19 = vrot.slane %v152_v14, 7  ;;  %v149_v20 = vadd.f32 %v197_v10, %v123_v16  ;;  %v151_v21 = vadd.f32 %v197_v10, %v133_v17 }
  0xe0   :  { %v178_v23 = vadd.f32 %v175_v15, %v160_v18  ;;  %v181_v24 = vadd.f32 %v175_v15, %v163_v19  ;;  %v159_v25 = vrot.slane %v149_v20, 7  ;;  %v162_v28 = vrot.slane %v151_v21, 7 }
  0xe2   :  { %184 = vst [vmem:[%s349_s5 + $0x10] sm:$0x1] %v178_v23  ;;  %187 = vst [vmem:[%s349_s5 + $0x28] sm:$0x1] %v181_v24  ;;  %v161_v29 = vsel %vm158_vm1, %v159_v25, %v160_v18  ;;  %v171_v30 = vsel %vm158_vm1, %v153_v22, %v159_v25  ;;  %v164_v31 = vsel %vm158_vm1, %v162_v28, %v163_v19 }
  0xe3   :  { %v172_v32 = vsel %vm158_vm1, %v153_v22, %v162_v28  ;;  %v176_v33 = vadd.f32 %v173_v26, %v171_v30  ;;  %v177_v34 = vadd.f32 %v174_v27, %v161_v29  ;;  %v180_v36 = vadd.f32 %v174_v27, %v164_v31 }
  0xe4   :  { %v179_v35 = vadd.f32 %v173_v26, %v172_v32 }
  0xe5   :  { %182 = vst [vmem:[%s349_s5] sm:$0xff] %v176_v33  ;;  %183 = vst [vmem:[%s349_s5 + $0x8] sm:$0xff] %v177_v34 }
  0xe6   :  { %185 = vst [vmem:[%s349_s5 + $0x18] sm:$0xff] %v179_v35  ;;  %186 = vst [vmem:[%s349_s5 + $0x20] sm:$0xff] %v180_v36 }
  0xe7   :  { %192 = vsyncpa [#allocation3], 1 }

</bundles_post_ra>
